<compile_context>
chip_gen: v6e
topology: v6e:2x2x1
jax: 0.10.0
libtpu: 0.0.40
codegen_flags: <defaults>
</compile_context>

<pallas_src>
import functools

import jax
import jax.numpy as jnp
from jax.experimental import pallas as pl
from jax.experimental.pallas import tpu as pltpu


def patch_embed_kernel(x_ref, w_ref, b_ref, o_ref):
    # x_ref: (TM, K) patches (compute dtype), w_ref: (K, E) (compute dtype),
    # b_ref: (1, E) f32, o_ref: (TM, E) out dtype.  MXU matmul, f32 accumulate.
    acc = jnp.dot(x_ref[...], w_ref[...], preferred_element_type=jnp.float32)
    o_ref[...] = (acc + b_ref[...]).astype(o_ref.dtype)


def prepare_patch_embed_params(conv_w, conv_b, compute_dtype=jnp.bfloat16):
    """Flatten Conv2d params once (hoisted out of the per-forward path).

    conv_w: (E, C, P, P) -> w_flat (K=C*P*P, E) in compute_dtype.
    conv_b: (E,)         -> b_flat (1, E) in f32 (bias is added after f32 accum).
    """
    E = conv_w.shape[0]
    K = conv_w.shape[1] * conv_w.shape[2] * conv_w.shape[3]
    w_flat = conv_w.reshape(E, K).T.astype(compute_dtype)   # (K, E), (c,kh,kw) order
    b_flat = conv_b.astype(jnp.float32).reshape(1, E)
    return w_flat, b_flat


def patch_embedding(x_nchw, w_flat, b_flat, patch_size, *,
                    tile_m=1024,
                    compute_dtype=jnp.bfloat16,
                    out_dtype=None,
                    vmem_tile_budget_bytes=40 * 1024 * 1024):
    """x_nchw: (B, C, H, W); w_flat: (C*P*P, E); b_flat: (1, E).
    Returns (B, num_patches, E), matching the PyTorch module's forward."""
    B, C, H, W = x_nchw.shape
    P = patch_size
    # PyTorch Conv2d(stride=P) floors any spatial remainder -> crop (no-op if aligned).
    Hp, Wp = H // P, W // P
    x_nchw = x_nchw[:, :, :Hp * P, :Wp * P]
    num_patches = Hp * Wp

    K, E = w_flat.shape
    assert K == C * P * P, "w_flat must be conv_w.reshape(E, C*P*P).T"

    if out_dtype is None:
        # Guard: never inherit a non-float input dtype for the embedding output.
        out_dtype = x_nchw.dtype if jnp.issubdtype(x_nchw.dtype, jnp.floating) \
            else jnp.float32
    out_dtype = jnp.dtype(out_dtype)

    # --- patch extraction: one transpose+cast producer.  With allow_input_fusion
    # on this operand, XLA may fuse it into the pallas_call input instead of
    # materializing `patches` in HBM.  Feature order (c, kh, kw) matches w_flat.
    xc = x_nchw.astype(compute_dtype)
    patches = xc.reshape(B, C, Hp, P, Wp, P)
    patches = patches.transpose(0, 2, 4, 1, 3, 5)            # (B, Hp, Wp, C, P, P)
    patches = patches.reshape(B * num_patches, K)             # (M, K)

    M = B * num_patches

    # --- choose TM: as large as the VMEM budget allows, sublane-aligned, no M pad.
    cbytes = jnp.dtype(compute_dtype).itemsize
    obytes = out_dtype.itemsize

    def footprint(tm):
        return (2 * tm * K * cbytes        # patch tiles, double-buffered
                + 1 * K * E * cbytes       # weights, single-buffered (Buffered(1))
                + E * 4                    # bias (single-buffered)
                + 2 * tm * E * obytes)     # output tiles, double-buffered

    TM = min(tile_m, M)
    if TM < M:
        TM = max(8, (TM // 8) * 8)         # sublane-aligned; ragged tail is masked
    while footprint(TM) > vmem_tile_budget_bytes and TM > 8:
        new_tm = max(8, (TM // 2) // 8 * 8)
        if new_tm == TM:
            break
        TM = new_tm

    grid = (pl.cdiv(M, TM),)               # ragged last block handled by Pallas

    out = pl.pallas_call(
        patch_embed_kernel,
        out_shape=jax.ShapeDtypeStruct((M, E), out_dtype),
        grid=grid,
        in_specs=[
            # Pipelined patch tiles (double-buffered by default).
            pl.BlockSpec((TM, K), lambda i: (i, 0)),
            # Resident weights/bias: constant block index -> single-buffer them.
            pl.BlockSpec((K, E), lambda i: (0, 0), pipeline_mode=pl.Buffered(1)),
            pl.BlockSpec((1, E), lambda i: (0, 0), pipeline_mode=pl.Buffered(1)),
        ],
        out_specs=pl.BlockSpec((TM, E), lambda i: (i, 0)),
        compiler_params=pltpu.CompilerParams(
            # Shard the M axis across v7x's two TensorCores.
            dimension_semantics=("parallel",),
            # <= 48 MiB is safe on v7x (64 MiB physical); plenty on v5e/v6e.
            vmem_limit_bytes=48 * 1024 * 1024,
            # Let XLA fuse the patch-extraction transpose/cast into operand 0.
            allow_input_fusion=[True, False, False],
        ),
    )(patches, w_flat, b_flat)

    # Conv spatial flatten order (H', W') row-major == our patch order, so this
    # leading-dim split reproduces flatten + permute(0, 2, 1) with zero copy.
    return out.reshape(B, num_patches, E)


if __name__ == "__main__":
    # Small shapes consistent with the module: B=2, C=4, H=W=16, patch=8, E=32.
    B, C, H, W = 2, 4, 16, 16
    patch_size = 8
    embedding_dim = 32

    key = jax.random.PRNGKey(0)
    kx, kw, kb = jax.random.split(key, 3)

    x = jax.random.normal(kx, (B, C, H, W), dtype=jnp.float32)
    # Deterministic synthetic parameters (shapes match nn.Conv2d(C, E, P, stride=P)).
    conv_w = jax.random.normal(kw, (embedding_dim, C, patch_size, patch_size),
                               dtype=jnp.float32) * 0.02
    conv_b = jax.random.normal(kb, (embedding_dim,), dtype=jnp.float32) * 0.02

    # Hoisted once: weight flatten/transpose/cast + bias prep (not per-forward).
    w_flat, b_flat = prepare_patch_embed_params(conv_w, conv_b)

    fwd = jax.jit(functools.partial(patch_embedding, patch_size=patch_size))
    out = fwd(x, w_flat, b_flat)
    jax.block_until_ready(out)

    # --- sanity checks -------------------------------------------------------
    Hp, Wp = H // patch_size, W // patch_size
    num_patches = Hp * Wp
    ref_patches = x.reshape(B, C, Hp, patch_size, Wp, patch_size)
    ref_patches = ref_patches.transpose(0, 2, 4, 1, 3, 5).reshape(
        B * num_patches, C * patch_size * patch_size)
    w_flat_ref = conv_w.reshape(embedding_dim, -1).T

    # (a) same-path reference: bf16 inputs, f32 accumulation.
    ref_bf16 = (ref_patches.astype(jnp.bfloat16).astype(jnp.float32)
                @ w_flat_ref.astype(jnp.bfloat16).astype(jnp.float32)
                + conv_b).reshape(B, num_patches, embedding_dim)
    # (b) pure-f32 reference (PyTorch Conv2d math): loose tol for bf16 rounding.
    ref_f32 = (ref_patches @ w_flat_ref + conv_b).reshape(
        B, num_patches, embedding_dim)

    assert out.shape == (B, num_patches, embedding_dim)
    assert out.dtype == x.dtype
    assert jnp.allclose(out, ref_bf16, atol=1e-3, rtol=1e-3)
    assert jnp.allclose(out, ref_f32, atol=3e-2, rtol=3e-2)

    print("KERNEL_OK")
</pallas_src>

<mosaic_0001>
module attributes {stable_mosaic.version = 11 : i64} {
  func.func @patch_embed_kernel(%arg0: i32, %arg1: memref<8x256xbf16, #tpu.memory_space<vmem>>, %arg2: memref<256x32xbf16, #tpu.memory_space<vmem>>, %arg3: memref<1x32xf32, #tpu.memory_space<vmem>>, %arg4: memref<8x32xf32, #tpu.memory_space<vmem>>) attributes {dimension_semantics = [#tpu.dimension_semantics<parallel>], iteration_bounds = array<i64: 1>, scalar_prefetch = 0 : i64, scratch_operands = 0 : i64, tpu.core_type = #tpu.core_type<tc>, window_params = [{transform_indices = @transform_0, window_bounds = array<i64: 8, 256>}, {pipeline_mode = #tpu.pipeline_mode<synchronous>, transform_indices = @transform_1, window_bounds = array<i64: 256, 32>}, {pipeline_mode = #tpu.pipeline_mode<synchronous>, transform_indices = @transform_2, window_bounds = array<i64: 1, 32>}, {transform_indices = @transform_3, window_bounds = array<i64: 8, 32>}]} {
    %c0 = arith.constant 0 : index
    %c0_0 = arith.constant 0 : index
    %0 = vector.load %arg1[%c0, %c0_0] : memref<8x256xbf16, #tpu.memory_space<vmem>>, vector<8x256xbf16>
    %c0_1 = arith.constant 0 : index
    %c0_2 = arith.constant 0 : index
    %1 = vector.load %arg2[%c0_1, %c0_2] : memref<256x32xbf16, #tpu.memory_space<vmem>>, vector<256x32xbf16>
    %cst = arith.constant dense<0.000000e+00> : vector<8x32xf32>
    %2 = tpu.matmul %0, %1, %cst {dimension_numbers = #tpu.dot_dimension_numbers<[1], [0], [0], [1], [0, 0, 1, 1], [], []>} : vector<8x256xbf16>, vector<256x32xbf16>, vector<8x32xf32> -> vector<8x32xf32>
    %c0_3 = arith.constant 0 : index
    %c0_4 = arith.constant 0 : index
    %3 = vector.load %arg3[%c0_3, %c0_4] : memref<1x32xf32, #tpu.memory_space<vmem>>, vector<1x32xf32>
    %4 = vector.broadcast %3 : vector<1x32xf32> to vector<8x32xf32>
    %5 = arith.addf %2, %4 : vector<8x32xf32>
    %c0_5 = arith.constant 0 : index
    %c0_6 = arith.constant 0 : index
    %6 = vector.load %arg4[%c0_5, %c0_6] : memref<8x32xf32, #tpu.memory_space<vmem>>, vector<8x32xf32>
    tpu.vector_store %arg4[%c0_5, %c0_6], %5 {strides = array<i32>} : memref<8x32xf32, #tpu.memory_space<vmem>>, vector<8x32xf32>,
    return
  }
  func.func @transform_0(%arg0: i32) -> (i32, i32) {
    %c0_i32 = arith.constant 0 : i32
    %c0_i32_0 = arith.constant 0 : i32
    return %arg0, %c0_i32 : i32, i32
  }
  func.func @transform_1(%arg0: i32) -> (i32, i32) {
    %c0_i32 = arith.constant 0 : i32
    %c0_i32_0 = arith.constant 0 : i32
    %c0_i32_1 = arith.constant 0 : i32
    return %c0_i32, %c0_i32_0 : i32, i32
  }
  func.func @transform_2(%arg0: i32) -> (i32, i32) {
    %c0_i32 = arith.constant 0 : i32
    %c0_i32_0 = arith.constant 0 : i32
    %c0_i32_1 = arith.constant 0 : i32
    return %c0_i32, %c0_i32_0 : i32, i32
  }
  func.func @transform_3(%arg0: i32) -> (i32, i32) {
    %c0_i32 = arith.constant 0 : i32
    %c0_i32_0 = arith.constant 0 : i32
    return %arg0, %c0_i32 : i32, i32
  }
}

</mosaic_0001>

<bundles_post_ra>
// kernel: patch_embedding.1
= control target key start
LH: loop header
LB: loop body
LE: loop exit
PB: predicated region body
PF: predicated region fallthrough
CT: control target
= control target key end

     0   :  { %s375_s0 = inlined_call_operand.vmem [shape: bf16[8,256], index: 0, kind: input, shape index: {}]   ;;  %s376_s1 = inlined_call_operand.vmem [shape: bf16[256,32], index: 1, kind: input, shape index: {}]   ;;  %s377_s2 = inlined_call_operand.vmem [shape: f32[1,32], index: 2, kind: input, shape index: {}]   ;;  %s378_s3 = inlined_call_operand.hbm [shape: f32[8,32], index: 3, kind: output, shape index: {}]  }
   0x1   :  { %v257_v0 = vld [vmem:[%s376_s1 + $0x78] sm:$0xff]   ;;  %v259_v2 = vld [vmem:[%s376_s1 + $0x70] sm:$0xff]   ;;  %v261_v4 = vld [vmem:[%s376_s1 + $0x68] sm:$0xff]  }
   0x2   :  { %v258_v1 = vld [vmem:[%s376_s1 + $0x38] sm:$0xff]   ;;  %234 = vmatprep.subr.bf16.mxu0 %v257_v0  ;;  %v260_v3 = vld [vmem:[%s376_s1 + $0x30] sm:$0xff]   ;;  %v262_v5 = vld [vmem:[%s376_s1 + $0x28] sm:$0xff]  }
   0x3   :  { %235 = vmatpush3.bf16.msra.mxu0 %v258_v1  ;;  %v263_v6 = vld [vmem:[%s376_s1 + $0x60] sm:$0xff]   ;;  %v265_v8 = vld [vmem:[%s376_s1 + $0x58] sm:$0xff]   ;;  %v267_v10 = vld [vmem:[%s376_s1 + $0x50] sm:$0xff]  }
   0x4   :  { %236 = vmatprep.subr.bf16.mxu0 %v259_v2  ;;  %v264_v7 = vld [vmem:[%s376_s1 + $0x20] sm:$0xff]   ;;  %v266_v9 = vld [vmem:[%s376_s1 + $0x18] sm:$0xff]  }
   0x5   :  { %v16_v11 = vld [vmem:[%s375_s0] sm:$0xff] }
   0x7   :  { %237 = vmatpush3.bf16.msra.mxu0 %v260_v3 }
   0x8   :  { %238 = vmatprep.subr.bf16.mxu0 %v261_v4 }
   0xb   :  { %239 = vmatpush3.bf16.msra.mxu0 %v262_v5 }
   0xc   :  { %240 = vmatprep.subr.bf16.mxu0 %v263_v6 }
   0xf   :  { %241 = vmatpush3.bf16.msra.mxu0 %v264_v7 }
  0x10   :  { %242 = vmatprep.subr.bf16.mxu0 %v265_v8 }
  0x11   :  { %8 = vsyncpa [#allocation3], 0  ;;  %v217_v12 = vcombine.high %v16_v11, %v16_v11  ;;  %v268_v13 = vld [vmem:[%s376_s1 + $0x10] sm:$0xff]   ;;  %v269_v14 = vld [vmem:[%s376_s1 + $0x48] sm:$0xff]   ;;  %v216_v18 = vcombine.low %v16_v11, %v16_v11  ;;  %s297_s20 = smov [#allocation2]   ;;  %vm199_vm0 = vcmask 261120  }
  0x12   :  { %v270_v15 = vld [vmem:[%s376_s1 + $0x8] sm:$0xff]   ;;  %v271_v16 = vld [vmem:[%s376_s1 + $0x40] sm:$0xff]   ;;  %s207_s21 = sshll.u32 %s297_s20, 4  ;;  %s208_s21 = int_to_ptr.vmem [resolvable:$true] %s207_s21 }
  0x13   :  { %243 = vmatpush3.bf16.msra.mxu0 %v266_v9  ;;  %191 = vmatprep.mubr.bf16.mxu0 %v217_v12  ;;  %v272_v17 = vld [vmem:[%s376_s1] sm:$0xff]   ;;  %s275_s1 = scalar_lea.vmem %s208_s21, 128  ;;  %p280_p1 = scmp.lt.s32.totalorder %s208_s21, %s208_s21 }
  0x14   :  { %244 = vmatprep.subr.bf16.mxu0 %v267_v10  ;;  %v215_v20 = vld [vmem:[%s377_s2] ss:$0 sm:$0xff]  ;;  %p276_p0 = scmp.ne.s32.totalorder %s208_s21, %s275_s1  ;;  %p281_p2 = scmp.lt.s32.totalorder %s275_s1, %s275_s1 }
  0x16   :  { %p282_p3 = por %p281_p2, %p280_p1 }
  0x17   :  { %245 = vmatpush3.bf16.msra.mxu0 %v268_v13 }
  0x18   :  { %246 = vmatprep.subr.bf16.mxu0 %v269_v14  ;;  %p283_p4 = pnand %p282_p3, %p276_p0 }
  0x1b   :  { %247 = vmatpush3.bf16.msra.mxu0 %v270_v15 }
  0x1c   :  { %248 = vmatprep.subr.bf16.mxu0 %v271_v16 }
  0x1f   :  { %249 = vmatpush3.bf16.msra.mxu0 %v272_v17 }
  0x22   :  { %192 = vmatmul.mubr.bf16.vlgmr.msra.gmra.mxu0 %v216_v18 }
  0xe2   :  { %v250_v19 = vpop.f32.mrf.mxu0 }
  0xe4   :  { %v251_v21 = vpop.f32.mrf.mxu0 }
  0xe5   :  { %v252_v22 = vadd.f32 %v251_v21, %v250_v19 }
  0xe6   :  { %v253_v23 = vpop.f32.mrf.mxu0 }
  0xe7   :  { %v194_v24 = vadd.f32 %v252_v22, %v215_v20 }
  0xe8   :  { %v254_v25 = vpop.f32.mrf.mxu0 }
  0xe9   :  { %200 = vst.msk [vmem:[#allocation2] sm:$0xff] %vm199_vm0, %v194_v24 }
  0xea   :  { %286 = shalt.err (!%p283_p4)
}
  0xeb   :  { %210 = dma.vmem_to_hbm [thread:$0]  %s208_s21, 128, %s378_s3, [#allocation3]  }
  0xec   :  { %295 = dma.done.wait [#allocation3], 128  }
  0xed   :  { %296 = vsyncadd [#allocation3], 4294967168 }
  0xee   :  { %214 = vsyncpa [#allocation3], 1 }

</bundles_post_ra>
